<compile_context>
chip_gen: v7x
topology: tpu7x:2x2x1
jax: 0.10.0
libtpu: 0.0.40
codegen_flags: <defaults>
</compile_context>

<pallas_src>
import functools

import jax
import jax.numpy as jnp
from jax.experimental import pallas as pl
from jax.experimental.pallas import tpu as pltpu

LANE = 128
SUBLANE = 8


def _round_up(x, m):
    return (x + m - 1) // m * m


def _vmem_cap_bytes():
    """Usable VMEM budget for this TPU generation (~80% of physical; 64 MiB fallback)."""
    try:
        info = pltpu.get_tpu_info()
        phys = getattr(info, "vmem_capacity_bytes", None) or (64 << 20)
    except Exception:
        phys = 64 << 20
    return int(phys * 0.8)


# --------------------------------------------------------------------------
# Kernel: one (tm, dim) row tile; inner grid axis walks hidden chunks
# (size 1 whenever the weights fit in VMEM, which is the common case).
# --------------------------------------------------------------------------
def ff_kernel(x_ref, w1_ref, b1_ref, w2_ref, b2_ref, g_ref, beta_ref, o_ref,
              acc_ref, *, eps, compute_dtype):
    k = pl.program_id(1)

    @pl.when(k == 0)
    def _init():
        acc_ref[...] = jnp.zeros_like(acc_ref)

    # ---- layer 0: WNLinear + Dropout(eval: identity) + ReLU ---------------
    # TODO(synk): training-mode dropout (stochastic mask) not implemented.
    xb = x_ref[...].astype(compute_dtype)              # in-kernel cast (VPU)
    h = jnp.dot(xb, w1_ref[...], preferred_element_type=jnp.float32)
    h = jnp.maximum(h + b1_ref[...], 0.0)               # f32

    # ---- layer 1: partial sum over this hidden chunk -----------------------
    acc_ref[...] += jnp.dot(h.astype(compute_dtype), w2_ref[...],
                            preferred_element_type=jnp.float32)

    # ---- LayerNorm epilogue (f32) on the last hidden chunk -----------------
    @pl.when(k == pl.num_programs(1) - 1)
    def _finalize():
        y = acc_ref[...] + b2_ref[...]
        inv_n = 1.0 / y.shape[-1]
        mu = jnp.sum(y, axis=-1, keepdims=True) * inv_n
        var = jnp.sum(y * y, axis=-1, keepdims=True) * inv_n - mu * mu
        var = jnp.maximum(var, 0.0)                      # guard f32 cancellation
        yhat = (y - mu) * jax.lax.rsqrt(var + eps)        # EUP rsqrt
        o_ref[...] = (yhat * g_ref[...] + beta_ref[...]).astype(o_ref.dtype)


# --------------------------------------------------------------------------
# One-time parameter preparation (hoisted out of the per-call path).
# --------------------------------------------------------------------------
def prepare_ff_params(w1, b1, w2, b2, ln_gamma, ln_beta, *,
                      compute_dtype=jnp.bfloat16):
    """Weights -> compute dtype; biases / LN params -> f32 (1, n) row vectors."""
    dim, hidden = w1.shape
    return (jnp.asarray(w1, compute_dtype),
            jnp.asarray(b1, jnp.float32).reshape(1, hidden),
            jnp.asarray(w2, compute_dtype),
            jnp.asarray(b2, jnp.float32).reshape(1, dim),
            jnp.asarray(ln_gamma, jnp.float32).reshape(1, dim),
            jnp.asarray(ln_beta, jnp.float32).reshape(1, dim))


# --------------------------------------------------------------------------
# Wrapper
# --------------------------------------------------------------------------
def feedforward_pallas(x, w1, b1, w2, b2, ln_gamma, ln_beta, *,
                       tm=1024, compute_dtype=jnp.bfloat16, out_dtype=None,
                       eps=1e-5):
    """x: (B, H, W, dim) channels-last. w1: (dim, hidden), w2: (hidden, dim).

    Pass out_dtype=jnp.bfloat16 if the consumer tolerates it: output stores are
    half of the streamed activation traffic of this memory-bound kernel.
    Params may be pre-prepared once via prepare_ff_params (per-call no-op then).
    """
    B, H, W, dim = x.shape
    hidden = w1.shape[1]
    assert w1.shape == (dim, hidden) and w2.shape == (hidden, dim)

    cdt = jnp.dtype(compute_dtype)
    out_dtype = out_dtype or x.dtype
    odt = jnp.dtype(out_dtype)

    # No-ops when prepare_ff_params() was already applied by the caller.
    w1, b1, w2, b2, ln_gamma, ln_beta = prepare_ff_params(
        w1, b1, w2, b2, ln_gamma, ln_beta, compute_dtype=cdt)

    # Raw (M, dim) views: no pad, no cast, no post-slice -> no extra HBM traffic.
    M = B * H * W
    xf = x.reshape(M, dim)
    x_it, out_it, w_it = x.dtype.itemsize, odt.itemsize, cdt.itemsize

    cap = _vmem_cap_bytes()

    # Hidden-dim chunking only when W1 + W2 would not fit the VMEM budget (v7x).
    w_bytes = 2 * dim * hidden * w_it
    k_chunks = 1
    if w_bytes > cap // 2 and hidden % LANE == 0:
        for k in range(2, hidden // LANE + 1):
            if hidden % k == 0 and (hidden // k) % LANE == 0 \
                    and 2 * (w_bytes // k) <= cap // 2:
                k_chunks = k
                break
    # TODO(synk): if no 128-aligned exact split of `hidden` exists, weights stay
    # fully resident (pad hidden on the host to enable chunking for huge configs).
    tk_h = hidden // k_chunks

    # Row tile: big by default; guarantee >= 2 grid steps so the "parallel" axis
    # can shard across both v7x TensorCores; shrink until the estimate fits VMEM.
    tm_eff = max(SUBLANE, min(_round_up(tm, SUBLANE),
                              _round_up(pl.cdiv(M, 2), SUBLANE)))

    def vmem_estimate(tmx, w_bufs):
        return (w_bufs * 2 * dim * tk_h * w_it         # W1 + W2 chunk(s)
                + 2 * tmx * dim * (x_it + out_it)      # streamed x/out tiles (2-buf)
                + 4 * (tk_h + 3 * dim) * 4             # b1, b2, gamma, beta
                + tmx * dim * 4                        # f32 accumulator scratch
                + tmx * dim * (cdt.itemsize + 4)       # x cast + y/yhat temporaries
                + tmx * tk_h * (4 + cdt.itemsize))     # h (f32) + h cast

    w_bufs_primary = 1 if k_chunks == 1 else 2
    while tm_eff > SUBLANE and 1.25 * vmem_estimate(tm_eff, w_bufs_primary) > cap:
        tm_eff = max(SUBLANE, _round_up(tm_eff // 2, SUBLANE))

    rows = pl.cdiv(M, tm_eff)

    flops = 4 * M * dim * hidden + 10 * M * dim
    w_reads = 1 if k_chunks == 1 else rows
    bytes_accessed = (M * dim * (x_it + out_it)
                      + 2 * dim * hidden * w_it * w_reads
                      + (hidden + 3 * dim) * 4)
    cost = pl.CostEstimate(flops=int(flops), transcendentals=int(M),
                           bytes_accessed=int(bytes_accessed))

    kernel = functools.partial(ff_kernel, eps=eps, compute_dtype=cdt)

    def build_call(single_buffer_resident):
        w_bufs = 1 if (k_chunks == 1 and single_buffer_resident) else 2
        vmem_limit = int(min(cap, max(32 << 20,
                                      1.25 * vmem_estimate(tm_eff, w_bufs))))

        def spec(shape, index_map, constant):
            if constant and single_buffer_resident:
                return pl.BlockSpec(shape, index_map,
                                    pipeline_mode=pl.Buffered(1))
            return pl.BlockSpec(shape, index_map)

        w_const = (k_chunks == 1)   # W1/W2/b1 blocks constant only when unchunked
        in_specs = [
            pl.BlockSpec((tm_eff, dim), lambda i, k: (i, 0)),     # x (streamed)
            spec((dim, tk_h), lambda i, k: (0, k), w_const),      # W1
            spec((1, tk_h), lambda i, k: (0, k), w_const),        # b1
            spec((tk_h, dim), lambda i, k: (k, 0), w_const),      # W2
            spec((1, dim), lambda i, k: (0, 0), True),            # b2
            spec((1, dim), lambda i, k: (0, 0), True),            # LN gamma
            spec((1, dim), lambda i, k: (0, 0), True),            # LN beta
        ]
        return pl.pallas_call(
            kernel,
            out_shape=jax.ShapeDtypeStruct((M, dim), out_dtype),
            grid_spec=pltpu.PrefetchScalarGridSpec(
                num_scalar_prefetch=0,
                grid=(rows, k_chunks),
                in_specs=in_specs,
                out_specs=pl.BlockSpec((tm_eff, dim), lambda i, k: (i, 0)),
                scratch_shapes=[pltpu.VMEM((tm_eff, dim), jnp.float32)],
            ),
            compiler_params=pltpu.CompilerParams(
                dimension_semantics=("parallel", "arbitrary"),
                vmem_limit_bytes=vmem_limit,
            ),
            cost_estimate=cost,
        )

    args = (xf, w1, b1, w2, b2, ln_gamma, ln_beta)
    try:
        out = build_call(True)(*args)
    except Exception:
        # pl.Buffered(1) unsupported on this jax/libtpu -> default double-buffering.
        out = build_call(False)(*args)

    return out.reshape(B, H, W, dim)


# --------------------------------------------------------------------------
# Parameter construction (weight_norm like PyTorch) and references
# --------------------------------------------------------------------------
def weight_norm_effective(v, g):
    """PyTorch weight_norm(dim=0): W = g * v / ||v|| with norm over in-dim, per out-row."""
    norm = jnp.sqrt(jnp.sum(v * v, axis=1, keepdims=True))
    return g * v / norm


def make_params(key, dim, factor):
    hidden = dim * factor
    k = jax.random.split(key, 6)
    # PyTorch Linear weights are (out, in); build them that way then transpose.
    v1 = jax.random.normal(k[0], (hidden, dim), jnp.float32) * 0.1
    g1 = jax.random.normal(k[1], (hidden, 1), jnp.float32) * 0.1 + 1.0
    b1 = jax.random.normal(k[2], (hidden,), jnp.float32) * 0.1
    v2 = jax.random.normal(k[3], (dim, hidden), jnp.float32) * 0.1
    g2 = jax.random.normal(k[4], (dim, 1), jnp.float32) * 0.1 + 1.0
    b2 = jax.random.normal(k[5], (dim,), jnp.float32) * 0.1
    w1_eff = weight_norm_effective(v1, g1)  # (hidden, dim)
    w2_eff = weight_norm_effective(v2, g2)  # (dim, hidden)
    ln_gamma = jnp.ones((dim,), jnp.float32)
    ln_beta = jnp.zeros((dim,), jnp.float32)
    # Transpose to (in, out) for x @ W.
    return w1_eff.T, b1, w2_eff.T, b2, ln_gamma, ln_beta


def reference_fp32(x, w1, b1, w2, b2, g, beta):
    h = jnp.maximum(jnp.dot(x, w1) + b1, 0.0)
    y = jnp.dot(h, w2) + b2
    mu = jnp.mean(y, axis=-1, keepdims=True)
    var = jnp.mean((y - mu) ** 2, axis=-1, keepdims=True)
    return (y - mu) * jax.lax.rsqrt(var + 1e-5) * g + beta


def reference_mixed(x, w1, b1, w2, b2, g, beta, cdt=jnp.bfloat16):
    """Mirrors the kernel's mixed-precision math (bf16 matmul inputs, f32 accum/LN)."""
    xc = x.astype(cdt)
    h = jnp.dot(xc, w1.astype(cdt), preferred_element_type=jnp.float32) + b1
    h = jnp.maximum(h, 0.0)
    y = jnp.dot(h.astype(cdt), w2.astype(cdt),
                preferred_element_type=jnp.float32) + b2
    mu = jnp.mean(y, axis=-1, keepdims=True)
    var = jnp.mean(y * y, axis=-1, keepdims=True) - mu * mu
    return (y - mu) * jax.lax.rsqrt(var + 1e-5) * g + beta


if __name__ == "__main__":
    dim, factor = 32, 2
    B, H, W = 2, 8, 8

    key = jax.random.PRNGKey(0)
    kx, kp = jax.random.split(key)
    x = jax.random.normal(kx, (B, H, W, dim), jnp.float32)
    w1, b1, w2, b2, g, beta = make_params(kp, dim, factor)

    # One-time parameter prep (hoisted out of the per-call path).
    params = prepare_ff_params(w1, b1, w2, b2, g, beta)

    out = feedforward_pallas(x, *params)
    out = jax.block_until_ready(out)
    assert out.shape == (B, H, W, dim)

    # Tight check against a reference replicating the kernel's precision policy.
    ref_mx = reference_mixed(x, w1, b1, w2, b2, g, beta)
    assert jnp.allclose(out, ref_mx, atol=2e-3, rtol=2e-3), "mismatch vs mixed-precision ref"

    # Loose check against the full-f32 module semantics (bf16 streaming error only).
    ref_32 = reference_fp32(x, w1, b1, w2, b2, g, beta)
    assert jnp.allclose(out, ref_32, atol=8e-2, rtol=8e-2), "mismatch vs f32 ref"

    print("KERNEL_OK")
</pallas_src>

<mosaic_0001>
module attributes {stable_mosaic.version = 11 : i64} {
  func.func @ff_kernel(%arg0: i32, %arg1: i32, %arg2: memref<64x32xf32, #tpu.memory_space<vmem>>, %arg3: memref<32x64xbf16, #tpu.memory_space<vmem>>, %arg4: memref<1x64xf32, #tpu.memory_space<vmem>>, %arg5: memref<64x32xbf16, #tpu.memory_space<vmem>>, %arg6: memref<1x32xf32, #tpu.memory_space<vmem>>, %arg7: memref<1x32xf32, #tpu.memory_space<vmem>>, %arg8: memref<1x32xf32, #tpu.memory_space<vmem>>, %arg9: memref<64x32xf32, #tpu.memory_space<vmem>>, %arg10: memref<64x32xf32, #tpu.memory_space<vmem>>) attributes {dimension_semantics = [#tpu.dimension_semantics<parallel>, #tpu.dimension_semantics<arbitrary>], iteration_bounds = array<i64: 2, 1>, scalar_prefetch = 0 : i64, scratch_operands = 1 : i64, tpu.core_type = #tpu.core_type<tc>, window_params = [{transform_indices = @transform_0, window_bounds = array<i64: 64, 32>}, {pipeline_mode = #tpu.pipeline_mode<synchronous>, transform_indices = @transform_1, window_bounds = array<i64: 32, 64>}, {pipeline_mode = #tpu.pipeline_mode<synchronous>, transform_indices = @transform_2, window_bounds = array<i64: 1, 64>}, {pipeline_mode = #tpu.pipeline_mode<synchronous>, transform_indices = @transform_3, window_bounds = array<i64: 64, 32>}, {pipeline_mode = #tpu.pipeline_mode<synchronous>, transform_indices = @transform_4, window_bounds = array<i64: 1, 32>}, {pipeline_mode = #tpu.pipeline_mode<synchronous>, transform_indices = @transform_5, window_bounds = array<i64: 1, 32>}, {pipeline_mode = #tpu.pipeline_mode<synchronous>, transform_indices = @transform_6, window_bounds = array<i64: 1, 32>}, {transform_indices = @transform_7, window_bounds = array<i64: 64, 32>}]} {
    %c0_i32 = arith.constant 0 : i32
    %0 = arith.cmpi eq, %arg1, %c0_i32 : i32
    %1 = arith.extui %0 : i1 to i32
    %c0_i32_0 = arith.constant 0 : i32
    %2 = arith.cmpi ne, %1, %c0_i32_0 : i32
    scf.if %2 {
      %cst_16 = arith.constant 0.000000e+00 : f32
      %21 = vector.broadcast %cst_16 : f32 to vector<64x32xf32>
      %c0_17 = arith.constant 0 : index
      %c0_18 = arith.constant 0 : index
      %22 = vector.load %arg10[%c0_17, %c0_18] : memref<64x32xf32, #tpu.memory_space<vmem>>, vector<64x32xf32>
      tpu.vector_store %arg10[%c0_17, %c0_18], %21 {strides = array<i32>} : memref<64x32xf32, #tpu.memory_space<vmem>>, vector<64x32xf32>,
    } else {
    }
    %c0 = arith.constant 0 : index
    %c0_1 = arith.constant 0 : index
    %3 = vector.load %arg2[%c0, %c0_1] : memref<64x32xf32, #tpu.memory_space<vmem>>, vector<64x32xf32>
    %4 = arith.truncf %3 : vector<64x32xf32> to vector<64x32xbf16>
    %c0_2 = arith.constant 0 : index
    %c0_3 = arith.constant 0 : index
    %5 = vector.load %arg3[%c0_2, %c0_3] : memref<32x64xbf16, #tpu.memory_space<vmem>>, vector<32x64xbf16>
    %cst = arith.constant dense<0.000000e+00> : vector<64x64xf32>
    %6 = tpu.matmul %4, %5, %cst {dimension_numbers = #tpu.dot_dimension_numbers<[1], [0], [0], [1], [0, 0, 1, 1], [], []>} : vector<64x32xbf16>, vector<32x64xbf16>, vector<64x64xf32> -> vector<64x64xf32>
    %c0_4 = arith.constant 0 : index
    %c0_5 = arith.constant 0 : index
    %7 = vector.load %arg4[%c0_4, %c0_5] : memref<1x64xf32, #tpu.memory_space<vmem>>, vector<1x64xf32>
    %8 = vector.broadcast %7 : vector<1x64xf32> to vector<64x64xf32>
    %9 = arith.addf %6, %8 : vector<64x64xf32>
    %cst_6 = arith.constant 0.000000e+00 : f32
    %10 = vector.broadcast %cst_6 : f32 to vector<64x64xf32>
    %11 = arith.maximumf %9, %10 : vector<64x64xf32>
    %c0_7 = arith.constant 0 : index
    %c0_8 = arith.constant 0 : index
    %12 = vector.load %arg10[%c0_7, %c0_8] : memref<64x32xf32, #tpu.memory_space<vmem>>, vector<64x32xf32>
    %13 = arith.truncf %11 : vector<64x64xf32> to vector<64x64xbf16>
    %c0_9 = arith.constant 0 : index
    %c0_10 = arith.constant 0 : index
    %14 = vector.load %arg5[%c0_9, %c0_10] : memref<64x32xbf16, #tpu.memory_space<vmem>>, vector<64x32xbf16>
    %cst_11 = arith.constant dense<0.000000e+00> : vector<64x32xf32>
    %15 = tpu.matmul %13, %14, %cst_11 {dimension_numbers = #tpu.dot_dimension_numbers<[1], [0], [0], [1], [0, 0, 1, 1], [], []>} : vector<64x64xbf16>, vector<64x32xbf16>, vector<64x32xf32> -> vector<64x32xf32>
    %16 = arith.addf %12, %15 : vector<64x32xf32>
    %c0_12 = arith.constant 0 : index
    %c0_13 = arith.constant 0 : index
    %17 = vector.load %arg10[%c0_12, %c0_13] : memref<64x32xf32, #tpu.memory_space<vmem>>, vector<64x32xf32>
    tpu.vector_store %arg10[%c0_12, %c0_13], %16 {strides = array<i32>} : memref<64x32xf32, #tpu.memory_space<vmem>>, vector<64x32xf32>,
    %c0_i32_14 = arith.constant 0 : i32
    %18 = arith.cmpi eq, %arg1, %c0_i32_14 : i32
    %19 = arith.extui %18 : i1 to i32
    %c0_i32_15 = arith.constant 0 : i32
    %20 = arith.cmpi ne, %19, %c0_i32_15 : i32
    scf.if %20 {
      %c0_16 = arith.constant 0 : index
      %c0_17 = arith.constant 0 : index
      %21 = vector.load %arg10[%c0_16, %c0_17] : memref<64x32xf32, #tpu.memory_space<vmem>>, vector<64x32xf32>
      %c0_18 = arith.constant 0 : index
      %c0_19 = arith.constant 0 : index
      %22 = vector.load %arg6[%c0_18, %c0_19] : memref<1x32xf32, #tpu.memory_space<vmem>>, vector<1x32xf32>
      %23 = vector.broadcast %22 : vector<1x32xf32> to vector<64x32xf32>
      %24 = arith.addf %21, %23 : vector<64x32xf32>
      %cst_20 = arith.constant dense<0.000000e+00> : vector<64xf32>
      %25 = vector.multi_reduction <add>, %24, %cst_20 [1] : vector<64x32xf32> to vector<64xf32>
      %26 = vector.shape_cast %25 : vector<64xf32> to vector<64x1xf32>
      %cst_21 = arith.constant 3.125000e-02 : f32
      %27 = vector.broadcast %cst_21 : f32 to vector<64x1xf32>
      %28 = arith.mulf %26, %27 : vector<64x1xf32>
      %29 = arith.mulf %24, %24 : vector<64x32xf32>
      %cst_22 = arith.constant dense<0.000000e+00> : vector<64xf32>
      %30 = vector.multi_reduction <add>, %29, %cst_22 [1] : vector<64x32xf32> to vector<64xf32>
      %31 = vector.shape_cast %30 : vector<64xf32> to vector<64x1xf32>
      %cst_23 = arith.constant 3.125000e-02 : f32
      %32 = vector.broadcast %cst_23 : f32 to vector<64x1xf32>
      %33 = arith.mulf %31, %32 : vector<64x1xf32>
      %34 = arith.mulf %28, %28 : vector<64x1xf32>
      %35 = arith.subf %33, %34 : vector<64x1xf32>
      %cst_24 = arith.constant 0.000000e+00 : f32
      %36 = vector.broadcast %cst_24 : f32 to vector<64x1xf32>
      %37 = arith.maximumf %35, %36 : vector<64x1xf32>
      %38 = vector.broadcast %28 : vector<64x1xf32> to vector<64x32xf32>
      %39 = arith.subf %24, %38 : vector<64x32xf32>
      %cst_25 = arith.constant 9.99999974E-6 : f32
      %40 = vector.broadcast %cst_25 : f32 to vector<64x1xf32>
      %41 = arith.addf %37, %40 : vector<64x1xf32>
      %42 = math.rsqrt %41 : vector<64x1xf32>
      %43 = vector.broadcast %42 : vector<64x1xf32> to vector<64x32xf32>
      %44 = arith.mulf %39, %43 : vector<64x32xf32>
      %c0_26 = arith.constant 0 : index
      %c0_27 = arith.constant 0 : index
      %45 = vector.load %arg7[%c0_26, %c0_27] : memref<1x32xf32, #tpu.memory_space<vmem>>, vector<1x32xf32>
      %46 = vector.broadcast %45 : vector<1x32xf32> to vector<64x32xf32>
      %47 = arith.mulf %44, %46 : vector<64x32xf32>
      %c0_28 = arith.constant 0 : index
      %c0_29 = arith.constant 0 : index
      %48 = vector.load %arg8[%c0_28, %c0_29] : memref<1x32xf32, #tpu.memory_space<vmem>>, vector<1x32xf32>
      %49 = vector.broadcast %48 : vector<1x32xf32> to vector<64x32xf32>
      %50 = arith.addf %47, %49 : vector<64x32xf32>
      %c0_30 = arith.constant 0 : index
      %c0_31 = arith.constant 0 : index
      %51 = vector.load %arg9[%c0_30, %c0_31] : memref<64x32xf32, #tpu.memory_space<vmem>>, vector<64x32xf32>
      tpu.vector_store %arg9[%c0_30, %c0_31], %50 {strides = array<i32>} : memref<64x32xf32, #tpu.memory_space<vmem>>, vector<64x32xf32>,
    } else {
    }
    return
  }
  func.func @transform_0(%arg0: i32, %arg1: i32) -> (i32, i32) {
    %c0_i32 = arith.constant 0 : i32
    %c0_i32_0 = arith.constant 0 : i32
    return %arg0, %c0_i32 : i32, i32
  }
  func.func @transform_1(%arg0: i32, %arg1: i32) -> (i32, i32) {
    %c0_i32 = arith.constant 0 : i32
    %c0_i32_0 = arith.constant 0 : i32
    return %c0_i32, %arg1 : i32, i32
  }
  func.func @transform_2(%arg0: i32, %arg1: i32) -> (i32, i32) {
    %c0_i32 = arith.constant 0 : i32
    %c0_i32_0 = arith.constant 0 : i32
    return %c0_i32, %arg1 : i32, i32
  }
  func.func @transform_3(%arg0: i32, %arg1: i32) -> (i32, i32) {
    %c0_i32 = arith.constant 0 : i32
    %c0_i32_0 = arith.constant 0 : i32
    return %arg1, %c0_i32 : i32, i32
  }
  func.func @transform_4(%arg0: i32, %arg1: i32) -> (i32, i32) {
    %c0_i32 = arith.constant 0 : i32
    %c0_i32_0 = arith.constant 0 : i32
    %c0_i32_1 = arith.constant 0 : i32
    return %c0_i32, %c0_i32_0 : i32, i32
  }
  func.func @transform_5(%arg0: i32, %arg1: i32) -> (i32, i32) {
    %c0_i32 = arith.constant 0 : i32
    %c0_i32_0 = arith.constant 0 : i32
    %c0_i32_1 = arith.constant 0 : i32
    return %c0_i32, %c0_i32_0 : i32, i32
  }
  func.func @transform_6(%arg0: i32, %arg1: i32) -> (i32, i32) {
    %c0_i32 = arith.constant 0 : i32
    %c0_i32_0 = arith.constant 0 : i32
    %c0_i32_1 = arith.constant 0 : i32
    return %c0_i32, %c0_i32_0 : i32, i32
  }
  func.func @transform_7(%arg0: i32, %arg1: i32) -> (i32, i32) {
    %c0_i32 = arith.constant 0 : i32
    %c0_i32_0 = arith.constant 0 : i32
    return %arg0, %c0_i32 : i32, i32
  }
}

module attributes {stable_mosaic.version = 11 : i64} {
  func.func @ff_kernel(%arg0: i32, %arg1: i32, %arg2: memref<64x32xf32, #tpu.memory_space<vmem>>, %arg3: memref<32x64xbf16, #tpu.memory_space<vmem>>, %arg4: memref<1x64xf32, #tpu.memory_space<vmem>>, %arg5: memref<64x32xbf16, #tpu.memory_space<vmem>>, %arg6: memref<1x32xf32, #tpu.memory_space<vmem>>, %arg7: memref<1x32xf32, #tpu.memory_space<vmem>>, %arg8: memref<1x32xf32, #tpu.memory_space<vmem>>, %arg9: memref<64x32xf32, #tpu.memory_space<vmem>>, %arg10: memref<64x32xf32, #tpu.memory_space<vmem>>) attributes {dimension_semantics = [#tpu.dimension_semantics<parallel>, #tpu.dimension_semantics<arbitrary>], iteration_bounds = array<i64: 2, 1>, scalar_prefetch = 0 : i64, scratch_operands = 1 : i64, tpu.core_type = #tpu.core_type<tc>, window_params = [{transform_indices = @transform_0, window_bounds = array<i64: 64, 32>}, {transform_indices = @transform_1, window_bounds = array<i64: 32, 64>}, {transform_indices = @transform_2, window_bounds = array<i64: 1, 64>}, {transform_indices = @transform_3, window_bounds = array<i64: 64, 32>}, {pipeline_mode = #tpu.pipeline_mode<synchronous>, transform_indices = @transform_4, window_bounds = array<i64: 1, 32>}, {pipeline_mode = #tpu.pipeline_mode<synchronous>, transform_indices = @transform_5, window_bounds = array<i64: 1, 32>}, {pipeline_mode = #tpu.pipeline_mode<synchronous>, transform_indices = @transform_6, window_bounds = array<i64: 1, 32>}, {transform_indices = @transform_7, window_bounds = array<i64: 64, 32>}]} {
    %c0_i32 = arith.constant 0 : i32
    %0 = arith.cmpi eq, %arg1, %c0_i32 : i32
    %1 = arith.extui %0 : i1 to i32
    %c0_i32_0 = arith.constant 0 : i32
    %2 = arith.cmpi ne, %1, %c0_i32_0 : i32
    scf.if %2 {
      %cst_16 = arith.constant 0.000000e+00 : f32
      %21 = vector.broadcast %cst_16 : f32 to vector<64x32xf32>
      %c0_17 = arith.constant 0 : index
      %c0_18 = arith.constant 0 : index
      %22 = vector.load %arg10[%c0_17, %c0_18] : memref<64x32xf32, #tpu.memory_space<vmem>>, vector<64x32xf32>
      tpu.vector_store %arg10[%c0_17, %c0_18], %21 {strides = array<i32>} : memref<64x32xf32, #tpu.memory_space<vmem>>, vector<64x32xf32>,
    } else {
    }
    %c0 = arith.constant 0 : index
    %c0_1 = arith.constant 0 : index
    %3 = vector.load %arg2[%c0, %c0_1] : memref<64x32xf32, #tpu.memory_space<vmem>>, vector<64x32xf32>
    %4 = arith.truncf %3 : vector<64x32xf32> to vector<64x32xbf16>
    %c0_2 = arith.constant 0 : index
    %c0_3 = arith.constant 0 : index
    %5 = vector.load %arg3[%c0_2, %c0_3] : memref<32x64xbf16, #tpu.memory_space<vmem>>, vector<32x64xbf16>
    %cst = arith.constant dense<0.000000e+00> : vector<64x64xf32>
    %6 = tpu.matmul %4, %5, %cst {dimension_numbers = #tpu.dot_dimension_numbers<[1], [0], [0], [1], [0, 0, 1, 1], [], []>} : vector<64x32xbf16>, vector<32x64xbf16>, vector<64x64xf32> -> vector<64x64xf32>
    %c0_4 = arith.constant 0 : index
    %c0_5 = arith.constant 0 : index
    %7 = vector.load %arg4[%c0_4, %c0_5] : memref<1x64xf32, #tpu.memory_space<vmem>>, vector<1x64xf32>
    %8 = vector.broadcast %7 : vector<1x64xf32> to vector<64x64xf32>
    %9 = arith.addf %6, %8 : vector<64x64xf32>
    %cst_6 = arith.constant 0.000000e+00 : f32
    %10 = vector.broadcast %cst_6 : f32 to vector<64x64xf32>
    %11 = arith.maximumf %9, %10 : vector<64x64xf32>
    %c0_7 = arith.constant 0 : index
    %c0_8 = arith.constant 0 : index
    %12 = vector.load %arg10[%c0_7, %c0_8] : memref<64x32xf32, #tpu.memory_space<vmem>>, vector<64x32xf32>
    %13 = arith.truncf %11 : vector<64x64xf32> to vector<64x64xbf16>
    %c0_9 = arith.constant 0 : index
    %c0_10 = arith.constant 0 : index
    %14 = vector.load %arg5[%c0_9, %c0_10] : memref<64x32xbf16, #tpu.memory_space<vmem>>, vector<64x32xbf16>
    %cst_11 = arith.constant dense<0.000000e+00> : vector<64x32xf32>
    %15 = tpu.matmul %13, %14, %cst_11 {dimension_numbers = #tpu.dot_dimension_numbers<[1], [0], [0], [1], [0, 0, 1, 1], [], []>} : vector<64x64xbf16>, vector<64x32xbf16>, vector<64x32xf32> -> vector<64x32xf32>
    %16 = arith.addf %12, %15 : vector<64x32xf32>
    %c0_12 = arith.constant 0 : index
    %c0_13 = arith.constant 0 : index
    %17 = vector.load %arg10[%c0_12, %c0_13] : memref<64x32xf32, #tpu.memory_space<vmem>>, vector<64x32xf32>
    tpu.vector_store %arg10[%c0_12, %c0_13], %16 {strides = array<i32>} : memref<64x32xf32, #tpu.memory_space<vmem>>, vector<64x32xf32>,
    %c0_i32_14 = arith.constant 0 : i32
    %18 = arith.cmpi eq, %arg1, %c0_i32_14 : i32
    %19 = arith.extui %18 : i1 to i32
    %c0_i32_15 = arith.constant 0 : i32
    %20 = arith.cmpi ne, %19, %c0_i32_15 : i32
    scf.if %20 {
      %c0_16 = arith.constant 0 : index
      %c0_17 = arith.constant 0 : index
      %21 = vector.load %arg10[%c0_16, %c0_17] : memref<64x32xf32, #tpu.memory_space<vmem>>, vector<64x32xf32>
      %c0_18 = arith.constant 0 : index
      %c0_19 = arith.constant 0 : index
      %22 = vector.load %arg6[%c0_18, %c0_19] : memref<1x32xf32, #tpu.memory_space<vmem>>, vector<1x32xf32>
      %23 = vector.broadcast %22 : vector<1x32xf32> to vector<64x32xf32>
      %24 = arith.addf %21, %23 : vector<64x32xf32>
      %cst_20 = arith.constant dense<0.000000e+00> : vector<64xf32>
      %25 = vector.multi_reduction <add>, %24, %cst_20 [1] : vector<64x32xf32> to vector<64xf32>
      %26 = vector.shape_cast %25 : vector<64xf32> to vector<64x1xf32>
      %cst_21 = arith.constant 3.125000e-02 : f32
      %27 = vector.broadcast %cst_21 : f32 to vector<64x1xf32>
      %28 = arith.mulf %26, %27 : vector<64x1xf32>
      %29 = arith.mulf %24, %24 : vector<64x32xf32>
      %cst_22 = arith.constant dense<0.000000e+00> : vector<64xf32>
      %30 = vector.multi_reduction <add>, %29, %cst_22 [1] : vector<64x32xf32> to vector<64xf32>
      %31 = vector.shape_cast %30 : vector<64xf32> to vector<64x1xf32>
      %cst_23 = arith.constant 3.125000e-02 : f32
      %32 = vector.broadcast %cst_23 : f32 to vector<64x1xf32>
      %33 = arith.mulf %31, %32 : vector<64x1xf32>
      %34 = arith.mulf %28, %28 : vector<64x1xf32>
      %35 = arith.subf %33, %34 : vector<64x1xf32>
      %cst_24 = arith.constant 0.000000e+00 : f32
      %36 = vector.broadcast %cst_24 : f32 to vector<64x1xf32>
      %37 = arith.maximumf %35, %36 : vector<64x1xf32>
      %38 = vector.broadcast %28 : vector<64x1xf32> to vector<64x32xf32>
      %39 = arith.subf %24, %38 : vector<64x32xf32>
      %cst_25 = arith.constant 9.99999974E-6 : f32
      %40 = vector.broadcast %cst_25 : f32 to vector<64x1xf32>
      %41 = arith.addf %37, %40 : vector<64x1xf32>
      %42 = math.rsqrt %41 : vector<64x1xf32>
      %43 = vector.broadcast %42 : vector<64x1xf32> to vector<64x32xf32>
      %44 = arith.mulf %39, %43 : vector<64x32xf32>
      %c0_26 = arith.constant 0 : index
      %c0_27 = arith.constant 0 : index
      %45 = vector.load %arg7[%c0_26, %c0_27] : memref<1x32xf32, #tpu.memory_space<vmem>>, vector<1x32xf32>
      %46 = vector.broadcast %45 : vector<1x32xf32> to vector<64x32xf32>
      %47 = arith.mulf %44, %46 : vector<64x32xf32>
      %c0_28 = arith.constant 0 : index
      %c0_29 = arith.constant 0 : index
      %48 = vector.load %arg8[%c0_28, %c0_29] : memref<1x32xf32, #tpu.memory_space<vmem>>, vector<1x32xf32>
      %49 = vector.broadcast %48 : vector<1x32xf32> to vector<64x32xf32>
      %50 = arith.addf %47, %49 : vector<64x32xf32>
      %c0_30 = arith.constant 0 : index
      %c0_31 = arith.constant 0 : index
      %51 = vector.load %arg9[%c0_30, %c0_31] : memref<64x32xf32, #tpu.memory_space<vmem>>, vector<64x32xf32>
      tpu.vector_store %arg9[%c0_30, %c0_31], %50 {strides = array<i32>} : memref<64x32xf32, #tpu.memory_space<vmem>>, vector<64x32xf32>,
    } else {
    }
    return
  }
  func.func @transform_0(%arg0: i32, %arg1: i32) -> (i32, i32) {
    %c0_i32 = arith.constant 0 : i32
    %c0_i32_0 = arith.constant 0 : i32
    return %arg0, %c0_i32 : i32, i32
  }
  func.func @transform_1(%arg0: i32, %arg1: i32) -> (i32, i32) {
    %c0_i32 = arith.constant 0 : i32
    %c0_i32_0 = arith.constant 0 : i32
    return %c0_i32, %arg1 : i32, i32
  }
  func.func @transform_2(%arg0: i32, %arg1: i32) -> (i32, i32) {
    %c0_i32 = arith.constant 0 : i32
    %c0_i32_0 = arith.constant 0 : i32
    return %c0_i32, %arg1 : i32, i32
  }
  func.func @transform_3(%arg0: i32, %arg1: i32) -> (i32, i32) {
    %c0_i32 = arith.constant 0 : i32
    %c0_i32_0 = arith.constant 0 : i32
    return %arg1, %c0_i32 : i32, i32
  }
  func.func @transform_4(%arg0: i32, %arg1: i32) -> (i32, i32) {
    %c0_i32 = arith.constant 0 : i32
    %c0_i32_0 = arith.constant 0 : i32
    %c0_i32_1 = arith.constant 0 : i32
    return %c0_i32, %c0_i32_0 : i32, i32
  }
  func.func @transform_5(%arg0: i32, %arg1: i32) -> (i32, i32) {
    %c0_i32 = arith.constant 0 : i32
    %c0_i32_0 = arith.constant 0 : i32
    %c0_i32_1 = arith.constant 0 : i32
    return %c0_i32, %c0_i32_0 : i32, i32
  }
  func.func @transform_6(%arg0: i32, %arg1: i32) -> (i32, i32) {
    %c0_i32 = arith.constant 0 : i32
    %c0_i32_0 = arith.constant 0 : i32
    %c0_i32_1 = arith.constant 0 : i32
    return %c0_i32, %c0_i32_0 : i32, i32
  }
  func.func @transform_7(%arg0: i32, %arg1: i32) -> (i32, i32) {
    %c0_i32 = arith.constant 0 : i32
    %c0_i32_0 = arith.constant 0 : i32
    return %arg0, %c0_i32 : i32, i32
  }
}

</mosaic_0001>

<bundles_post_ra>
// kernel: tpu_custom_call.1
= control target key start
LH: loop header
LB: loop body
LE: loop exit
PB: predicated region body
PF: predicated region fallthrough
CT: control target
= control target key end

     0   :  { %s1105_s24 = smov 0   ;;  %s1107_s25 = smov 0   ;;  %s1326_s0 = inlined_call_operand.vmem [shape: f32[128,32], index: 0, kind: input, shape index: {}]   ;;  %s1327_s1 = inlined_call_operand.vmem [shape: bf16[32,64], index: 1, kind: input, shape index: {}]   ;;  %s1328_s2 = inlined_call_operand.vmem [shape: f32[1,64], index: 2, kind: input, shape index: {}]   ;;  %s1329_s3 = inlined_call_operand.vmem [shape: bf16[64,32], index: 3, kind: input, shape index: {}]   ;;  %s1330_s4 = inlined_call_operand.vmem [shape: f32[1,32], index: 4, kind: input, shape index: {}]   ;;  %s1331_s5 = inlined_call_operand.vmem [shape: f32[1,32], index: 5, kind: input, shape index: {}]   ;;  %s1332_s6 = inlined_call_operand.vmem [shape: f32[1,32], index: 6, kind: input, shape index: {}]   ;;  %s1333_s7 = inlined_call_operand.vmem [shape: f32[128,32], index: 7, kind: output, shape index: {}]  }
   0x1   :  { %s1109_s26 = smov 0  }
   0x2 LB: > { %s29_s27 = sadd.s32 1, %s1058_s25  ;;  %p926_p0 = scmp.ge.s32.totalorder %s1062_s26, 1  ;;  %s1062_s26 = sphi %s1109_s26, %s17_s26   ;;  %s1058_s25 = sphi %s1107_s25, %s1335_s25   ;;  %s1054_s24 = sphi %s1105_s24, %s1334_s24  }
   0x3   : > { %p31_p1 = scmp.ge.s32.totalorder %s29_s27, 2  ;;  %p278_p2 = scmp.lt.s32.totalorder %s1062_s26, 3 }
   0x5   : > { %s1337_s27 = smov (%p31_p1, %s29_s27), 0  ;;  %p279_p3 = pnand %p926_p0, %p278_p2 }
   0x6   : > { %v1018_v0 = vld [vmem:[%s1327_s1] sm:$0xff] (!%p279_p3)   ;;  %s927_s30 = sshll.u32 (!%p279_p3), %s1054_s24, 3  ;;  %v1019_v1 = vld [vmem:[%s1327_s1 + $0x8] sm:$0xff] (!%p279_p3)   ;;  %vm352_vm0 = vcmask (!%p279_p3), 261120   ;;  %v1022_v16 = vld [vmem:[%s1329_s3 + $0x10] sm:$0xff] (!%p279_p3)   ;;  %v1064_v18 = vmov (!%p279_p3), 0.0  }
   0x7   : > { %282 = sbr.rel (%p279_p3) target bundleno = 665 (0x299), region = 48  ;;  %p323_p4 = scmp.lt.s32.totalorder (!%p279_p3), %s927_s30, 15  ;;  %965 = vmatprep.subr.bf16.mxu0 (!%p279_p3), %v1018_v0  ;;  %v1020_v2 = vld [vmem:[%s1329_s3] sm:$0xff] (!%p279_p3)   ;;  %v1021_v3 = vld [vmem:[%s1329_s3 + $0x8] sm:$0xff] (!%p279_p3)   ;;  %v1023_v17 = vld [vmem:[%s1329_s3 + $0x18] sm:$0xff] (!%p279_p3)   ;;  %355 = vst.msk [vmem:[#allocation2 + $0x10] sm:$0xff] (!%p279_p3), %vm352_vm0, %v1064_v18 }
   0x8   : > { %966 = vmatpush3.bf16.msra.mxu0 (!%p279_p3), %v1018_v0  ;;  %977 = vmatprep.subr.bf16.mxu1 (!%p279_p3), %v1020_v2  ;;  %353 = vst.msk [vmem:[#allocation2] sm:$0xff] (!%p279_p3), %vm352_vm0, %v1064_v18  ;;  %354 = vst.msk [vmem:[#allocation2 + $0x8] sm:$0xff] (!%p279_p3), %vm352_vm0, %v1064_v18  ;;  %v931_v19 = vld [vmem:[%s1328_s2] ss:$0 sm:$0xff] (!%p279_p3)  ;;  %vm526_vm1 = vcmask (!%p279_p3), 523264  }
   0x9   : > { %967 = vmatprep.subr.bf16.mxu0 (!%p279_p3), %v1019_v1  ;;  %978 = vmatpush3.bf16.msra.mxu1 (!%p279_p3), %v1020_v2  ;;  %356 = vst.msk [vmem:[#allocation2 + $0x18] sm:$0xff] (!%p279_p3), %vm352_vm0, %v1064_v18  ;;  %357 = vst.msk [vmem:[#allocation2 + $0x20] sm:$0xff] (!%p279_p3), %vm352_vm0, %v1064_v18  ;;  %v946_v0 = vld [vmem:[%s1330_s4] ss:$0 sm:$0xff] (!%p279_p3) }
   0xa   : > { %979 = vmatprep.subr.bf16.mxu1 (!%p279_p3), %v1021_v3  ;;  %358 = vst.msk [vmem:[#allocation2 + $0x28] sm:$0xff] (!%p279_p3), %vm352_vm0, %v1064_v18  ;;  %359 = vst.msk [vmem:[#allocation2 + $0x30] sm:$0xff] (!%p279_p3), %vm352_vm0, %v1064_v18 }
   0xb   : > { %360 = vst.msk [vmem:[#allocation2 + $0x38] sm:$0xff] (!%p279_p3), %vm352_vm0, %v1064_v18 }
   0xc   : > { %968 = vmatpush3.bf16.msra.mxu0 (!%p279_p3), %v1019_v1 }
   0xd   : > { %980 = vmatpush3.bf16.msra.mxu1 (!%p279_p3), %v1021_v3 }
   0xe   : > { %s1339_s30 = smov (!%p323_p4, %s927_s30), 15  ;;  %981 = vmatprep.subr.bf16.mxu1 %v1022_v16  ;;  %v484_v48 = vld [vmem:[#allocation2 + $0x10] sm:$0xff] }
   0xf   : > { %s928_s14 = sshll.u32 %s1339_s30, 3  ;;  %v482_v49 = vld [vmem:[#allocation2] sm:$0xff]  ;;  %v483_v54 = vld [vmem:[#allocation2 + $0x8] sm:$0xff] }
  0x10   : > { %s326_s17 = scalar_lea.vmem %s1326_s0, %s928_s14  ;;  %v485_v51 = vld [vmem:[#allocation2 + $0x18] sm:$0xff]  ;;  %v486_v61 = vld [vmem:[#allocation2 + $0x20] sm:$0xff]  ;;  %s1271_s13 = scalar_lea.vmem %s1333_s7, %s928_s14 }
  0x11   : > { %v361_v4 = vld [vmem:[%s326_s17] sm:$0xff]  ;;  %v362_v5 = vld [vmem:[%s326_s17 + $0x8] sm:$0xff]  ;;  %v363_v6 = vld [vmem:[%s326_s17 + $0x10] sm:$0xff]  ;;  %982 = vmatpush3.bf16.msra.mxu1 %v1022_v16 }
  0x12   : > { %v369_v7 = vpack.c.bf16 %v362_v5, %v361_v4  ;;  %v364_v8 = vld [vmem:[%s326_s17 + $0x18] sm:$0xff]  ;;  %v365_v9 = vld [vmem:[%s326_s17 + $0x20] sm:$0xff]  ;;  %v366_v10 = vld [vmem:[%s326_s17 + $0x28] sm:$0xff]  ;;  %983 = vmatprep.subr.bf16.mxu1 %v1023_v17 }
  0x13   : > { %v370_v11 = vpack.c.bf16 %v364_v8, %v363_v6  ;;  %v371_v12 = vpack.c.bf16 %v366_v10, %v365_v9  ;;  %v367_v13 = vld [vmem:[%s326_s17 + $0x30] sm:$0xff]  ;;  %v368_v14 = vld [vmem:[%s326_s17 + $0x38] sm:$0xff]  ;;  %v487_v3 = vld [vmem:[#allocation2 + $0x28] sm:$0xff] }
  0x14   : > { %969 = vmatprep.mubr.msk.bf16.mxu0 %vm352_vm0, %v369_v7  ;;  %v372_v15 = vpack.c.bf16 %v368_v14, %v367_v13  ;;  %v488_v60 = vld [vmem:[#allocation2 + $0x30] sm:$0xff]  ;;  %v489_v63 = vld [vmem:[#allocation2 + $0x38] sm:$0xff] }
  0x15   : > { %970 = vmatmul.mubr.msk.bf16.vlgmr.msra.gmra.mrb[0].mxu0 %vm352_vm0, %v370_v11  ;;  %984 = vmatpush3.bf16.msra.mxu1 %v1023_v17 }
  0x16   : > { %973 = vmatprep.mubr.msk.bf16.mxu0 %vm352_vm0, %v371_v12 }
  0x1d   : > { %974 = vmatmul.mubr.msk.bf16.gmra.mrb[4].mxu0 %vm352_vm0, %v372_v15 }
  0xe8   : > { %v971_v20 = vpop.f32.mrb[0].mxu0 }
  0xe9   : > { %v452_v21 = vadd.f32 %v971_v20, %v931_v19  ;;  %v443_v22 = vpop.f32.mrb[1].mxu0 }
  0xea   : > { %v444_v23 = vadd.f32 %v931_v19, %v443_v22  ;;  %v972_v24 = vpop.f32.mrb[2].mxu0 }
  0xeb   : > { %v455_v25 = vadd.f32 %v972_v24, %v931_v19  ;;  %v446_v26 = vpop.f32.mrb[3].mxu0  ;;  %v476_v28 = vmax.f32 %v452_v21, 0.0 }
  0xec   : > { %v447_v27 = vadd.f32 %v931_v19, %v446_v26  ;;  %v474_v30 = vmax.f32 %v444_v23, 0.0 }
  0xed   : > { %v477_v29 = vmax.f32 %v455_v25, 0.0 }
  0xee   : > { %v475_v31 = vmax.f32 %v447_v27, 0.0 }
  0xef   : > { %v491_v32 = vpack.c.bf16 %v477_v29, %v476_v28 }
  0xf0   : > { %v975_v33 = vpop.f32.mrb[4].mxu0  ;;  %v490_v34 = vpack.c.bf16 %v475_v31, %v474_v30 }
  0xf1   : > { %v468_v35 = vadd.f32 %v975_v33, %v931_v19  ;;  %v459_v36 = vpop.f32.mrb[5].mxu0 }
  0xf2   : > { %v460_v37 = vadd.f32 %v931_v19, %v459_v36  ;;  %v976_v38 = vpop.f32.mrb[6].mxu0  ;;  %985 = vmatprep.mubr.msk.bf16.mxu1 %vm526_vm1, %v490_v34 }
  0xf3   : > { %v480_v39 = vmax.f32 %v468_v35, 0.0  ;;  %v471_v40 = vadd.f32 %v976_v38, %v931_v19  ;;  %v462_v41 = vpop.f32.mrb[7].mxu0  ;;  %986 = vmatmul.mubr.msk.bf16.vlgmr.msra.gmra.mrb[0].mxu1 %vm526_vm1, %v491_v32 }
  0xf4   : > { %v478_v42 = vmax.f32 %v460_v37, 0.0  ;;  %v463_v43 = vadd.f32 %v931_v19, %v462_v41 }
  0xf5   : > { %v481_v44 = vmax.f32 %v471_v40, 0.0 }
  0xf6   : > { %v479_v45 = vmax.f32 %v463_v43, 0.0 }
  0xf7   : > { %v493_v46 = vpack.c.bf16 %v481_v44, %v480_v39 }
  0xf8   : > { %v492_v47 = vpack.c.bf16 %v479_v45, %v478_v42 }
  0xfa   : > { %989 = vmatprep.mubr.msk.bf16.mxu1 %vm526_vm1, %v492_v47 }
  0xfb   : > { %990 = vmatmul.mubr.msk.bf16.gmra.mrb[4].mxu1 %vm526_vm1, %v493_v46 }
 0x1c6   : > { %v987_v50 = vpop.f32.mrb[0].mxu1 }
 0x1c7   : > { %v606_v52 = vadd.f32 %v987_v50, %v484_v48  ;;  %v573_v53 = vpop.f32.mrb[1].mxu1 }
 0x1c8   : > { %v604_v55 = vadd.f32 %v573_v53, %v482_v49  ;;  %v988_v56 = vpop.f32.mrb[2].mxu1 }
 0x1c9   : > { %614 = vst.msk [vmem:[#allocation2 + $0x10] sm:$0xff] %vm352_vm0, %v606_v52  ;;  %v607_v57 = vadd.f32 %v988_v56, %v485_v51  ;;  %v576_v58 = vpop.f32.mrb[3].mxu1 }
 0x1ca   : > { %612 = vst.msk [vmem:[#allocation2] sm:$0xff] %vm352_vm0, %v604_v55  ;;  %v605_v59 = vadd.f32 %v576_v58, %v483_v54 }
 0x1cb   : > { %615 = vst.msk [vmem:[#allocation2 + $0x18] sm:$0xff] %vm352_vm0, %v607_v57 }
 0x1cc   : > { %613 = vst.msk [vmem:[#allocation2 + $0x8] sm:$0xff] %vm352_vm0, %v605_v59 }
 0x1ce   : > { %v991_v62 = vpop.f32.mrb[4].mxu1 }
 0x1cf   : > { %v610_v1 = vadd.f32 %v991_v62, %v488_v60  ;;  %v589_v2 = vpop.f32.mrb[5].mxu1 }
 0x1d0   : > { %v608_v4 = vadd.f32 %v589_v2, %v486_v61  ;;  %v992_v5 = vpop.f32.mrb[6].mxu1  ;;  %v625_v6 = vld [vmem:[#allocation2 + $0x10] sm:$0xff] }
 0x1d1   : > { %618 = vst.msk [vmem:[#allocation2 + $0x30] sm:$0xff] %vm352_vm0, %v610_v1  ;;  %v611_v7 = vadd.f32 %v992_v5, %v489_v63  ;;  %v592_v8 = vpop.f32.mrb[7].mxu1  ;;  %v1176_v9 = vadd.f32 %v946_v0, %v625_v6  ;;  %v623_v10 = vld [vmem:[#allocation2] sm:$0xff] }
 0x1d2   : > { %616 = vst.msk [vmem:[#allocation2 + $0x20] sm:$0xff] %vm352_vm0, %v608_v4  ;;  %v609_v11 = vadd.f32 %v592_v8, %v487_v3  ;;  %v1179_v12 = vadd.f32 %v946_v0, %v623_v10  ;;  %v626_v13 = vld [vmem:[#allocation2 + $0x18] sm:$0xff] }
 0x1d3   : > { %619 = vst.msk [vmem:[#allocation2 + $0x38] sm:$0xff] %vm352_vm0, %v611_v7  ;;  %v652_v14 = vsel %vm352_vm0, %v1176_v9, 0.0  ;;  %v1184_v15 = vadd.f32 %v946_v0, %v626_v13  ;;  %v680_v17 = vmul.f32 %v1176_v9, %v1176_v9  ;;  %v624_v18 = vld [vmem:[#allocation2 + $0x8] sm:$0xff] }
 0x1d4   : > { %617 = vst.msk [vmem:[#allocation2 + $0x28] sm:$0xff] %vm352_vm0, %v609_v11  ;;  %653 = vadd.xlane.f32.xlu1 %v652_v14  ;;  %v646_v16 = vsel %vm352_vm0, %v1179_v12, 0.0  ;;  %v1195_v21 = vadd.f32 %v946_v0, %v624_v18  ;;  %v678_v26 = vmul.f32 %v1179_v12, %v1179_v12 }
 0x1d5   : > { %647 = vadd.xlane.f32.xlu0 %v646_v16  ;;  %v655_v19 = vsel %vm352_vm0, %v1184_v15, 0.0  ;;  %v681_v20 = vmul.f32 %v1184_v15, %v1184_v15  ;;  %v692_v22 = vsel %vm352_vm0, %v680_v17, 0.0 }
 0x1d6   : > { %v679_v24 = vmul.f32 %v1195_v21, %v1195_v21  ;;  %v649_v25 = vsel %vm352_vm0, %v1195_v21, 0.0  ;;  %v686_v31 = vsel %vm352_vm0, %v678_v26, 0.0 }
 0x1d7   : > { %v695_v23 = vsel %vm352_vm0, %v681_v20, 0.0 }
 0x1d8   : > { %656 = vadd.xlane.f32.xlu1 %v655_v19  ;;  %v629_v28 = vld [vmem:[#allocation2 + $0x30] sm:$0xff]  ;;  %v689_v29 = vsel %vm352_vm0, %v679_v24, 0.0 }
 0x1d9   : > { %693 = vadd.xlane.f32.xlu0 %v692_v22  ;;  %v1209_v32 = vadd.f32 %v946_v0, %v629_v28  ;;  %v627_v34 = vld [vmem:[#allocation2 + $0x20] sm:$0xff] }
 0x1da   : > { %v630_v27 = vld [vmem:[#allocation2 + $0x38] sm:$0xff]  ;;  %v1217_v38 = vadd.f32 %v946_v0, %v627_v34 }
 0x1db   : > { %v1206_v30 = vadd.f32 %v946_v0, %v630_v27  ;;  %v628_v33 = vld [vmem:[#allocation2 + $0x28] sm:$0xff]  ;;  %v664_v37 = vsel %vm352_vm0, %v1209_v32, 0.0  ;;  %v684_v46 = vmul.f32 %v1209_v32, %v1209_v32 }
 0x1dc   : > { %696 = vadd.xlane.f32.xlu1 %v695_v23  ;;  %v1213_v36 = vadd.f32 %v946_v0, %v628_v33  ;;  %v658_v41 = vsel %vm352_vm0, %v1217_v38, 0.0  ;;  %v682_v42 = vmul.f32 %v1217_v38, %v1217_v38 }
 0x1dd   : > { %650 = vadd.xlane.f32.xlu0 %v649_v25  ;;  %v667_v35 = vsel %vm352_vm0, %v1206_v30, 0.0  ;;  %v685_v44 = vmul.f32 %v1206_v30, %v1206_v30  ;;  %v704_v48 = vsel %vm352_vm0, %v684_v46, 0.0 }
 0x1de   : > { %v661_v39 = vsel %vm352_vm0, %v1213_v36, 0.0  ;;  %v683_v40 = vmul.f32 %v1213_v36, %v1213_v36  ;;  %v698_v45 = vsel %vm352_vm0, %v682_v42, 0.0 }
 0x1df   : > { %v707_v47 = vsel %vm352_vm0, %v685_v44, 0.0 }
 0x1e0   : > { %690 = vadd.xlane.f32.xlu1 %v689_v29  ;;  %v701_v43 = vsel %vm352_vm0, %v683_v40, 0.0  ;;  %v1251_v29 = vld [vmem:[%s1331_s5] ss:$0 sm:$0xff] }
 0x1e1   : > { %687 = vadd.xlane.f32.xlu0 %v686_v31 }
 0x1e4   : > { %668 = vadd.xlane.f32.xlu1 %v667_v35 }
 0x1e5   : > { %665 = vadd.xlane.f32.xlu0 %v664_v37 }
 0x1e8   : > { %662 = vadd.xlane.f32.xlu1 %v661_v39 }
 0x1e9   : > { %659 = vadd.xlane.f32.xlu0 %v658_v41 }
 0x1ec   : > { %702 = vadd.xlane.f32.xlu1 %v701_v43 }
 0x1ed   : > { %699 = vadd.xlane.f32.xlu0 %v698_v45 }
 0x1f0   : > { %708 = vadd.xlane.f32.xlu1 %v707_v47 }
 0x1f1   : > { %705 = vadd.xlane.f32.xlu0 %v704_v48 }
 0x261   : > { %v654_v49 = vpop.xlane.xlu1 %653 }
 0x262   : > { %v648_v50 = vpop.xlane.xlu0 %647  ;;  %v672_v51 = vmul.f32 0.03125, %v654_v49 }
 0x263   : > { %v1235_v62 = vmul.f32 0.03125, %v648_v50 }
 0x264   : > { %v720_v55 = vmul.f32 %v672_v51, %v672_v51  ;;  %v744_v27 = vsub.f32 %v1176_v9, %v672_v51  ;;  %v1261_v9 = vld [vmem:[%s1332_s6] ss:$0 sm:$0xff] }
 0x265   : > { %v657_v52 = vpop.xlane.xlu1 %656  ;;  %v718_v8 = vmul.f32 %v1235_v62, %v1235_v62 }
 0x266   : > { %v673_v53 = vmul.f32 0.03125, %v657_v52  ;;  %v694_v54 = vpop.xlane.xlu0 %693 }
 0x267   : > { %v712_v56 = vmul.f32 0.03125, %v694_v54 }
 0x268   : > { %v721_v59 = vmul.f32 %v673_v53, %v673_v53  ;;  %v745_v40 = vsub.f32 %v1184_v15, %v673_v53 }
 0x269   : > { %v728_v57 = vsub.f32 %v712_v56, %v720_v55  ;;  %v697_v58 = vpop.xlane.xlu1 %696 }
 0x26a   : > { %v713_v60 = vmul.f32 0.03125, %v697_v58  ;;  %v651_v61 = vpop.xlane.xlu0 %650 }
 0x26b   : > { %v736_v63 = vmax.f32 %v728_v57, 0.0  ;;  %v1237_v0 = vmul.f32 0.03125, %v651_v61 }
 0x26c   : > { %v729_v1 = vsub.f32 %v713_v60, %v721_v59 }
 0x26d   : > { %v752_v2 = vadd.f32 1e-05, %v736_v63  ;;  %v719_v3 = vmul.f32 %v1237_v0, %v1237_v0  ;;  %v691_v4 = vpop.xlane.xlu1 %690  ;;  %v743_v47 = vsub.f32 %v1195_v21, %v1237_v0  ;;  %v742_v21 = vsub.f32 %v1179_v12, %v1235_v62 }
 0x26e   : > { %v737_v5 = vmax.f32 %v729_v1, 0.0  ;;  %v711_v6 = vmul.f32 0.03125, %v691_v4  ;;  %v688_v7 = vpop.xlane.xlu0 %687 }
 0x26f   : > { %1024 = vrsqrt.f32 %v752_v2  ;;  %v710_v10 = vmul.f32 0.03125, %v688_v7 }
 0x270   : > { %v753_v11 = vadd.f32 1e-05, %v737_v5  ;;  %v727_v13 = vsub.f32 %v711_v6, %v719_v3 }
 0x271   : > { %v726_v14 = vsub.f32 %v710_v10, %v718_v8  ;;  %v669_v16 = vpop.xlane.xlu1 %668 }
 0x272   : > { %1026 = vrsqrt.f32 %v753_v11  ;;  %v735_v17 = vmax.f32 %v727_v13, 0.0  ;;  %v666_v18 = vpop.xlane.xlu0 %665  ;;  %v1253_v34 = vmul.f32 0.03125, %v669_v16 }
 0x273   : > { %v734_v19 = vmax.f32 %v726_v14, 0.0  ;;  %v676_v41 = vmul.f32 0.03125, %v666_v18 }
 0x274   : > { %v751_v20 = vadd.f32 1e-05, %v735_v17  ;;  %v725_v51 = vmul.f32 %v1253_v34, %v1253_v34 }
 0x275   : > { %v750_v22 = vadd.f32 1e-05, %v734_v19  ;;  %v663_v23 = vpop.xlane.xlu1 %662  ;;  %v724_v56 = vmul.f32 %v676_v41, %v676_v41 }
 0x276   : > { %1028 = vrsqrt.f32 %v751_v20  ;;  %v1243_v24 = vmul.f32 0.03125, %v663_v23  ;;  %v660_v25 = vpop.xlane.xlu0 %659  ;;  %v749_v20 = vsub.f32 %v1206_v30, %v1253_v34 }
 0x277   : > { %1030 = vrsqrt.f32 %v750_v22  ;;  %v1245_v26 = vmul.f32 0.03125, %v660_v25  ;;  %v748_v25 = vsub.f32 %v1209_v32, %v676_v41 }
 0x278   : > { %v723_v35 = vmul.f32 %v1243_v24, %v1243_v24  ;;  %v747_v13 = vsub.f32 %v1213_v36, %v1243_v24 }
 0x279   : > { %v1025_v28 = vpop.eup %1024  ;;  %v703_v31 = vpop.xlane.xlu1 %702  ;;  %v722_v42 = vmul.f32 %v1245_v26, %v1245_v26  ;;  %v746_v16 = vsub.f32 %v1217_v38, %v1245_v26 }
 0x27a   : > { %v768_v33 = vmul.f32 %v1025_v28, %v744_v27  ;;  %v715_v37 = vmul.f32 0.03125, %v703_v31  ;;  %v700_v39 = vpop.xlane.xlu0 %699 }
 0x27b   : > { %v714_v43 = vmul.f32 0.03125, %v700_v39 }
 0x27c   : > { %v1027_v44 = vpop.eup %1026  ;;  %v783_v45 = vmul.f32 %v1251_v29, %v768_v33  ;;  %v731_v46 = vsub.f32 %v715_v37, %v723_v35 }
 0x27d   : > { %v769_v15 = vmul.f32 %v1027_v44, %v745_v40  ;;  %v730_v48 = vsub.f32 %v714_v43, %v722_v42  ;;  %v709_v49 = vpop.xlane.xlu1 %708 }
 0x27e   : > { %v798_v50 = vadd.f32 %v1261_v9, %v783_v45  ;;  %v739_v52 = vmax.f32 %v731_v46, 0.0  ;;  %v717_v53 = vmul.f32 0.03125, %v709_v49  ;;  %v706_v54 = vpop.xlane.xlu0 %705 }
 0x27f   : > { %v784_v55 = vmul.f32 %v1251_v29, %v769_v15  ;;  %v738_v57 = vmax.f32 %v730_v48, 0.0  ;;  %v716_v58 = vmul.f32 0.03125, %v706_v54 }
 0x280   : > { %v1029_v59 = vpop.eup %1028  ;;  %806 = vst.msk [vmem:[%s1271_s13 + $0x10] sm:$0xff] %vm352_vm0, %v798_v50  ;;  %v755_v60 = vadd.f32 1e-05, %v739_v52  ;;  %v733_v61 = vsub.f32 %v717_v53, %v725_v51 }
 0x281   : > { %v1031_v63 = vpop.eup %1030  ;;  %v799_v0 = vadd.f32 %v1261_v9, %v784_v55  ;;  %v767_v1 = vmul.f32 %v1029_v59, %v743_v47  ;;  %v754_v2 = vadd.f32 1e-05, %v738_v57  ;;  %v732_v3 = vsub.f32 %v716_v58, %v724_v56 }
 0x282   : > { %v766_v4 = vmul.f32 %v1031_v63, %v742_v21  ;;  %1032 = vrsqrt.f32 %v755_v60  ;;  %v741_v5 = vmax.f32 %v733_v61, 0.0 }
 0x283   : > { %807 = vst.msk [vmem:[%s1271_s13 + $0x18] sm:$0xff] %vm352_vm0, %v799_v0  ;;  %v782_v6 = vmul.f32 %v1251_v29, %v767_v1  ;;  %1034 = vrsqrt.f32 %v754_v2  ;;  %v740_v12 = vmax.f32 %v732_v3, 0.0 }
 0x284   : > { %v781_v62 = vmul.f32 %v1251_v29, %v766_v4  ;;  %v757_v7 = vadd.f32 1e-05, %v741_v5 }
 0x285   : > { %v797_v8 = vadd.f32 %v1261_v9, %v782_v6  ;;  %v756_v10 = vadd.f32 1e-05, %v740_v12 }
 0x286   : > { %v796_v11 = vadd.f32 %v1261_v9, %v781_v62  ;;  %1036 = vrsqrt.f32 %v757_v7 }
 0x287   : > { %805 = vst.msk [vmem:[%s1271_s13 + $0x8] sm:$0xff] %vm352_vm0, %v797_v8  ;;  %1038 = vrsqrt.f32 %v756_v10 }
 0x288   : > { %804 = vst.msk [vmem:[%s1271_s13] sm:$0xff] %vm352_vm0, %v796_v11 }
 0x28c   : > { %v1033_v14 = vpop.eup %1032 }
 0x28d   : > { %v1035_v17 = vpop.eup %1034  ;;  %v771_v18 = vmul.f32 %v1033_v14, %v747_v13 }
 0x28e   : > { %v770_v19 = vmul.f32 %v1035_v17, %v746_v16 }
 0x28f   : > { %v786_v22 = vmul.f32 %v1251_v29, %v771_v18 }
 0x290   : > { %v1037_v23 = vpop.eup %1036  ;;  %v785_v36 = vmul.f32 %v1251_v29, %v770_v19 }
 0x291   : > { %v1039_v24 = vpop.eup %1038  ;;  %v801_v27 = vadd.f32 %v1261_v9, %v786_v22  ;;  %v773_v38 = vmul.f32 %v1037_v23, %v749_v20 }
 0x292   : > { %v800_v26 = vadd.f32 %v1261_v9, %v785_v36  ;;  %v772_v28 = vmul.f32 %v1039_v24, %v748_v25 }
 0x293   : > { %809 = vst.msk [vmem:[%s1271_s13 + $0x28] sm:$0xff] %vm352_vm0, %v801_v27  ;;  %v788_v30 = vmul.f32 %v1251_v29, %v773_v38 }
 0x294   : > { %808 = vst.msk [vmem:[%s1271_s13 + $0x20] sm:$0xff] %vm352_vm0, %v800_v26  ;;  %v787_v31 = vmul.f32 %v1251_v29, %v772_v28 }
 0x295   : > { %v803_v33 = vadd.f32 %v1261_v9, %v788_v30 }
 0x296   : > { %v802_v32 = vadd.f32 %v1261_v9, %v787_v31 }
 0x297   : > { %811 = vst.msk [vmem:[%s1271_s13 + $0x38] sm:$0xff] %vm352_vm0, %v803_v33 }
 0x298   : > { %810 = vst.msk [vmem:[%s1271_s13 + $0x30] sm:$0xff] %vm352_vm0, %v802_v32 }
 0x299 PF: > { %s17_s26 = sadd.s32 1, %s1062_s26   ;;  %s1334_s24 = smov %s1058_s25 }
 0x29a   : > { %p14_p5 = scmp.ge.s32.totalorder %s17_s26, 4   ;;  %s1335_s25 = smov %s1337_s27 }
 0x29c   :  { %16 = sbr.rel (!%p14_p5) target bundleno = 2 (0x2), region = 95 }

// kernel: tpu_custom_call.1
= control target key start
LH: loop header
LB: loop body
LE: loop exit
PB: predicated region body
PF: predicated region fallthrough
CT: control target
= control target key end

     0   :  { %s1105_s24 = smov 0   ;;  %s1107_s25 = smov 0   ;;  %s1326_s0 = inlined_call_operand.vmem [shape: f32[128,32], index: 0, kind: input, shape index: {}]   ;;  %s1327_s1 = inlined_call_operand.vmem [shape: bf16[32,64], index: 1, kind: input, shape index: {}]   ;;  %s1328_s2 = inlined_call_operand.vmem [shape: f32[1,64], index: 2, kind: input, shape index: {}]   ;;  %s1329_s3 = inlined_call_operand.vmem [shape: bf16[64,32], index: 3, kind: input, shape index: {}]   ;;  %s1330_s4 = inlined_call_operand.vmem [shape: f32[1,32], index: 4, kind: input, shape index: {}]   ;;  %s1331_s5 = inlined_call_operand.vmem [shape: f32[1,32], index: 5, kind: input, shape index: {}]   ;;  %s1332_s6 = inlined_call_operand.vmem [shape: f32[1,32], index: 6, kind: input, shape index: {}]   ;;  %s1333_s7 = inlined_call_operand.vmem [shape: f32[128,32], index: 7, kind: output, shape index: {}]  }
   0x1   :  { %s1109_s26 = smov 0  }
   0x2 LB: > { %s29_s27 = sadd.s32 1, %s1058_s25  ;;  %p926_p0 = scmp.ge.s32.totalorder %s1062_s26, 1  ;;  %s1062_s26 = sphi %s1109_s26, %s17_s26   ;;  %s1058_s25 = sphi %s1107_s25, %s1335_s25   ;;  %s1054_s24 = sphi %s1105_s24, %s1334_s24  }
   0x3   : > { %p31_p1 = scmp.ge.s32.totalorder %s29_s27, 2  ;;  %p278_p2 = scmp.lt.s32.totalorder %s1062_s26, 3 }
   0x5   : > { %s1337_s27 = smov (%p31_p1, %s29_s27), 0  ;;  %p279_p3 = pnand %p926_p0, %p278_p2 }
   0x6   : > { %v1018_v0 = vld [vmem:[%s1327_s1] sm:$0xff] (!%p279_p3)   ;;  %s927_s30 = sshll.u32 (!%p279_p3), %s1054_s24, 3  ;;  %v1019_v1 = vld [vmem:[%s1327_s1 + $0x8] sm:$0xff] (!%p279_p3)   ;;  %vm352_vm0 = vcmask (!%p279_p3), 261120   ;;  %v1022_v16 = vld [vmem:[%s1329_s3 + $0x10] sm:$0xff] (!%p279_p3)   ;;  %v1064_v18 = vmov (!%p279_p3), 0.0  }
   0x7   : > { %282 = sbr.rel (%p279_p3) target bundleno = 665 (0x299), region = 48  ;;  %p323_p4 = scmp.lt.s32.totalorder (!%p279_p3), %s927_s30, 15  ;;  %965 = vmatprep.subr.bf16.mxu0 (!%p279_p3), %v1018_v0  ;;  %v1020_v2 = vld [vmem:[%s1329_s3] sm:$0xff] (!%p279_p3)   ;;  %v1021_v3 = vld [vmem:[%s1329_s3 + $0x8] sm:$0xff] (!%p279_p3)   ;;  %v1023_v17 = vld [vmem:[%s1329_s3 + $0x18] sm:$0xff] (!%p279_p3)   ;;  %355 = vst.msk [vmem:[#allocation2 + $0x10] sm:$0xff] (!%p279_p3), %vm352_vm0, %v1064_v18 }
   0x8   : > { %966 = vmatpush3.bf16.msra.mxu0 (!%p279_p3), %v1018_v0  ;;  %977 = vmatprep.subr.bf16.mxu1 (!%p279_p3), %v1020_v2  ;;  %353 = vst.msk [vmem:[#allocation2] sm:$0xff] (!%p279_p3), %vm352_vm0, %v1064_v18  ;;  %354 = vst.msk [vmem:[#allocation2 + $0x8] sm:$0xff] (!%p279_p3), %vm352_vm0, %v1064_v18  ;;  %v931_v19 = vld [vmem:[%s1328_s2] ss:$0 sm:$0xff] (!%p279_p3)  ;;  %vm526_vm1 = vcmask (!%p279_p3), 523264  }
   0x9   : > { %967 = vmatprep.subr.bf16.mxu0 (!%p279_p3), %v1019_v1  ;;  %978 = vmatpush3.bf16.msra.mxu1 (!%p279_p3), %v1020_v2  ;;  %356 = vst.msk [vmem:[#allocation2 + $0x18] sm:$0xff] (!%p279_p3), %vm352_vm0, %v1064_v18  ;;  %357 = vst.msk [vmem:[#allocation2 + $0x20] sm:$0xff] (!%p279_p3), %vm352_vm0, %v1064_v18  ;;  %v946_v0 = vld [vmem:[%s1330_s4] ss:$0 sm:$0xff] (!%p279_p3) }
   0xa   : > { %979 = vmatprep.subr.bf16.mxu1 (!%p279_p3), %v1021_v3  ;;  %358 = vst.msk [vmem:[#allocation2 + $0x28] sm:$0xff] (!%p279_p3), %vm352_vm0, %v1064_v18  ;;  %359 = vst.msk [vmem:[#allocation2 + $0x30] sm:$0xff] (!%p279_p3), %vm352_vm0, %v1064_v18 }
   0xb   : > { %360 = vst.msk [vmem:[#allocation2 + $0x38] sm:$0xff] (!%p279_p3), %vm352_vm0, %v1064_v18 }
   0xc   : > { %968 = vmatpush3.bf16.msra.mxu0 (!%p279_p3), %v1019_v1 }
   0xd   : > { %980 = vmatpush3.bf16.msra.mxu1 (!%p279_p3), %v1021_v3 }
   0xe   : > { %s1339_s30 = smov (!%p323_p4, %s927_s30), 15  ;;  %981 = vmatprep.subr.bf16.mxu1 %v1022_v16  ;;  %v484_v48 = vld [vmem:[#allocation2 + $0x10] sm:$0xff] }
   0xf   : > { %s928_s14 = sshll.u32 %s1339_s30, 3  ;;  %v482_v49 = vld [vmem:[#allocation2] sm:$0xff]  ;;  %v483_v54 = vld [vmem:[#allocation2 + $0x8] sm:$0xff] }
  0x10   : > { %s326_s17 = scalar_lea.vmem %s1326_s0, %s928_s14  ;;  %v485_v51 = vld [vmem:[#allocation2 + $0x18] sm:$0xff]  ;;  %v486_v61 = vld [vmem:[#allocation2 + $0x20] sm:$0xff]  ;;  %s1271_s13 = scalar_lea.vmem %s1333_s7, %s928_s14 }
  0x11   : > { %v361_v4 = vld [vmem:[%s326_s17] sm:$0xff]  ;;  %v362_v5 = vld [vmem:[%s326_s17 + $0x8] sm:$0xff]  ;;  %v363_v6 = vld [vmem:[%s326_s17 + $0x10] sm:$0xff]  ;;  %982 = vmatpush3.bf16.msra.mxu1 %v1022_v16 }
  0x12   : > { %v369_v7 = vpack.c.bf16 %v362_v5, %v361_v4  ;;  %v364_v8 = vld [vmem:[%s326_s17 + $0x18] sm:$0xff]  ;;  %v365_v9 = vld [vmem:[%s326_s17 + $0x20] sm:$0xff]  ;;  %v366_v10 = vld [vmem:[%s326_s17 + $0x28] sm:$0xff]  ;;  %983 = vmatprep.subr.bf16.mxu1 %v1023_v17 }
  0x13   : > { %v370_v11 = vpack.c.bf16 %v364_v8, %v363_v6  ;;  %v371_v12 = vpack.c.bf16 %v366_v10, %v365_v9  ;;  %v367_v13 = vld [vmem:[%s326_s17 + $0x30] sm:$0xff]  ;;  %v368_v14 = vld [vmem:[%s326_s17 + $0x38] sm:$0xff]  ;;  %v487_v3 = vld [vmem:[#allocation2 + $0x28] sm:$0xff] }
  0x14   : > { %969 = vmatprep.mubr.msk.bf16.mxu0 %vm352_vm0, %v369_v7  ;;  %v372_v15 = vpack.c.bf16 %v368_v14, %v367_v13  ;;  %v488_v60 = vld [vmem:[#allocation2 + $0x30] sm:$0xff]  ;;  %v489_v63 = vld [vmem:[#allocation2 + $0x38] sm:$0xff] }
  0x15   : > { %970 = vmatmul.mubr.msk.bf16.vlgmr.msra.gmra.mrb[0].mxu0 %vm352_vm0, %v370_v11  ;;  %984 = vmatpush3.bf16.msra.mxu1 %v1023_v17 }
  0x16   : > { %973 = vmatprep.mubr.msk.bf16.mxu0 %vm352_vm0, %v371_v12 }
  0x1d   : > { %974 = vmatmul.mubr.msk.bf16.gmra.mrb[4].mxu0 %vm352_vm0, %v372_v15 }
  0xe8   : > { %v971_v20 = vpop.f32.mrb[0].mxu0 }
  0xe9   : > { %v452_v21 = vadd.f32 %v971_v20, %v931_v19  ;;  %v443_v22 = vpop.f32.mrb[1].mxu0 }
  0xea   : > { %v444_v23 = vadd.f32 %v931_v19, %v443_v22  ;;  %v972_v24 = vpop.f32.mrb[2].mxu0 }
  0xeb   : > { %v455_v25 = vadd.f32 %v972_v24, %v931_v19  ;;  %v446_v26 = vpop.f32.mrb[3].mxu0  ;;  %v476_v28 = vmax.f32 %v452_v21, 0.0 }
  0xec   : > { %v447_v27 = vadd.f32 %v931_v19, %v446_v26  ;;  %v474_v30 = vmax.f32 %v444_v23, 0.0 }
  0xed   : > { %v477_v29 = vmax.f32 %v455_v25, 0.0 }
  0xee   : > { %v475_v31 = vmax.f32 %v447_v27, 0.0 }
  0xef   : > { %v491_v32 = vpack.c.bf16 %v477_v29, %v476_v28 }
  0xf0   : > { %v975_v33 = vpop.f32.mrb[4].mxu0  ;;  %v490_v34 = vpack.c.bf16 %v475_v31, %v474_v30 }
  0xf1   : > { %v468_v35 = vadd.f32 %v975_v33, %v931_v19  ;;  %v459_v36 = vpop.f32.mrb[5].mxu0 }
  0xf2   : > { %v460_v37 = vadd.f32 %v931_v19, %v459_v36  ;;  %v976_v38 = vpop.f32.mrb[6].mxu0  ;;  %985 = vmatprep.mubr.msk.bf16.mxu1 %vm526_vm1, %v490_v34 }
  0xf3   : > { %v480_v39 = vmax.f32 %v468_v35, 0.0  ;;  %v471_v40 = vadd.f32 %v976_v38, %v931_v19  ;;  %v462_v41 = vpop.f32.mrb[7].mxu0  ;;  %986 = vmatmul.mubr.msk.bf16.vlgmr.msra.gmra.mrb[0].mxu1 %vm526_vm1, %v491_v32 }
  0xf4   : > { %v478_v42 = vmax.f32 %v460_v37, 0.0  ;;  %v463_v43 = vadd.f32 %v931_v19, %v462_v41 }
  0xf5   : > { %v481_v44 = vmax.f32 %v471_v40, 0.0 }
  0xf6   : > { %v479_v45 = vmax.f32 %v463_v43, 0.0 }
  0xf7   : > { %v493_v46 = vpack.c.bf16 %v481_v44, %v480_v39 }
  0xf8   : > { %v492_v47 = vpack.c.bf16 %v479_v45, %v478_v42 }
  0xfa   : > { %989 = vmatprep.mubr.msk.bf16.mxu1 %vm526_vm1, %v492_v47 }
  0xfb   : > { %990 = vmatmul.mubr.msk.bf16.gmra.mrb[4].mxu1 %vm526_vm1, %v493_v46 }
 0x1c6   : > { %v987_v50 = vpop.f32.mrb[0].mxu1 }
 0x1c7   : > { %v606_v52 = vadd.f32 %v987_v50, %v484_v48  ;;  %v573_v53 = vpop.f32.mrb[1].mxu1 }
 0x1c8   : > { %v604_v55 = vadd.f32 %v573_v53, %v482_v49  ;;  %v988_v56 = vpop.f32.mrb[2].mxu1 }
 0x1c9   : > { %614 = vst.msk [vmem:[#allocation2 + $0x10] sm:$0xff] %vm352_vm0, %v606_v52  ;;  %v607_v57 = vadd.f32 %v988_v56, %v485_v51  ;;  %v576_v58 = vpop.f32.mrb[3].mxu1 }
 0x1ca   : > { %612 = vst.msk [vmem:[#allocation2] sm:$0xff] %vm352_vm0, %v604_v55  ;;  %v605_v59 = vadd.f32 %v576_v58, %v483_v54 }
 0x1cb   : > { %615 = vst.msk [vmem:[#allocation2 + $0x18] sm:$0xff] %vm352_vm0, %v607_v57 }
 0x1cc   : > { %613 = vst.msk [vmem:[#allocation2 + $0x8] sm:$0xff] %vm352_vm0, %v605_v59 }
 0x1ce   : > { %v991_v62 = vpop.f32.mrb[4].mxu1 }
 0x1cf   : > { %v610_v1 = vadd.f32 %v991_v62, %v488_v60  ;;  %v589_v2 = vpop.f32.mrb[5].mxu1 }
 0x1d0   : > { %v608_v4 = vadd.f32 %v589_v2, %v486_v61  ;;  %v992_v5 = vpop.f32.mrb[6].mxu1  ;;  %v625_v6 = vld [vmem:[#allocation2 + $0x10] sm:$0xff] }
 0x1d1   : > { %618 = vst.msk [vmem:[#allocation2 + $0x30] sm:$0xff] %vm352_vm0, %v610_v1  ;;  %v611_v7 = vadd.f32 %v992_v5, %v489_v63  ;;  %v592_v8 = vpop.f32.mrb[7].mxu1  ;;  %v1176_v9 = vadd.f32 %v946_v0, %v625_v6  ;;  %v623_v10 = vld [vmem:[#allocation2] sm:$0xff] }
 0x1d2   : > { %616 = vst.msk [vmem:[#allocation2 + $0x20] sm:$0xff] %vm352_vm0, %v608_v4  ;;  %v609_v11 = vadd.f32 %v592_v8, %v487_v3  ;;  %v1179_v12 = vadd.f32 %v946_v0, %v623_v10  ;;  %v626_v13 = vld [vmem:[#allocation2 + $0x18] sm:$0xff] }
 0x1d3   : > { %619 = vst.msk [vmem:[#allocation2 + $0x38] sm:$0xff] %vm352_vm0, %v611_v7  ;;  %v652_v14 = vsel %vm352_vm0, %v1176_v9, 0.0  ;;  %v1184_v15 = vadd.f32 %v946_v0, %v626_v13  ;;  %v680_v17 = vmul.f32 %v1176_v9, %v1176_v9  ;;  %v624_v18 = vld [vmem:[#allocation2 + $0x8] sm:$0xff] }
 0x1d4   : > { %617 = vst.msk [vmem:[#allocation2 + $0x28] sm:$0xff] %vm352_vm0, %v609_v11  ;;  %653 = vadd.xlane.f32.xlu1 %v652_v14  ;;  %v646_v16 = vsel %vm352_vm0, %v1179_v12, 0.0  ;;  %v1195_v21 = vadd.f32 %v946_v0, %v624_v18  ;;  %v678_v26 = vmul.f32 %v1179_v12, %v1179_v12 }
 0x1d5   : > { %647 = vadd.xlane.f32.xlu0 %v646_v16  ;;  %v655_v19 = vsel %vm352_vm0, %v1184_v15, 0.0  ;;  %v681_v20 = vmul.f32 %v1184_v15, %v1184_v15  ;;  %v692_v22 = vsel %vm352_vm0, %v680_v17, 0.0 }
 0x1d6   : > { %v679_v24 = vmul.f32 %v1195_v21, %v1195_v21  ;;  %v649_v25 = vsel %vm352_vm0, %v1195_v21, 0.0  ;;  %v686_v31 = vsel %vm352_vm0, %v678_v26, 0.0 }
 0x1d7   : > { %v695_v23 = vsel %vm352_vm0, %v681_v20, 0.0 }
 0x1d8   : > { %656 = vadd.xlane.f32.xlu1 %v655_v19  ;;  %v629_v28 = vld [vmem:[#allocation2 + $0x30] sm:$0xff]  ;;  %v689_v29 = vsel %vm352_vm0, %v679_v24, 0.0 }
 0x1d9   : > { %693 = vadd.xlane.f32.xlu0 %v692_v22  ;;  %v1209_v32 = vadd.f32 %v946_v0, %v629_v28  ;;  %v627_v34 = vld [vmem:[#allocation2 + $0x20] sm:$0xff] }
 0x1da   : > { %v630_v27 = vld [vmem:[#allocation2 + $0x38] sm:$0xff]  ;;  %v1217_v38 = vadd.f32 %v946_v0, %v627_v34 }
 0x1db   : > { %v1206_v30 = vadd.f32 %v946_v0, %v630_v27  ;;  %v628_v33 = vld [vmem:[#allocation2 + $0x28] sm:$0xff]  ;;  %v664_v37 = vsel %vm352_vm0, %v1209_v32, 0.0  ;;  %v684_v46 = vmul.f32 %v1209_v32, %v1209_v32 }
 0x1dc   : > { %696 = vadd.xlane.f32.xlu1 %v695_v23  ;;  %v1213_v36 = vadd.f32 %v946_v0, %v628_v33  ;;  %v658_v41 = vsel %vm352_vm0, %v1217_v38, 0.0  ;;  %v682_v42 = vmul.f32 %v1217_v38, %v1217_v38 }
 0x1dd   : > { %650 = vadd.xlane.f32.xlu0 %v649_v25  ;;  %v667_v35 = vsel %vm352_vm0, %v1206_v30, 0.0  ;;  %v685_v44 = vmul.f32 %v1206_v30, %v1206_v30  ;;  %v704_v48 = vsel %vm352_vm0, %v684_v46, 0.0 }
 0x1de   : > { %v661_v39 = vsel %vm352_vm0, %v1213_v36, 0.0  ;;  %v683_v40 = vmul.f32 %v1213_v36, %v1213_v36  ;;  %v698_v45 = vsel %vm352_vm0, %v682_v42, 0.0 }
 0x1df   : > { %v707_v47 = vsel %vm352_vm0, %v685_v44, 0.0 }
 0x1e0   : > { %690 = vadd.xlane.f32.xlu1 %v689_v29  ;;  %v701_v43 = vsel %vm352_vm0, %v683_v40, 0.0  ;;  %v1251_v29 = vld [vmem:[%s1331_s5] ss:$0 sm:$0xff] }
 0x1e1   : > { %687 = vadd.xlane.f32.xlu0 %v686_v31 }
 0x1e4   : > { %668 = vadd.xlane.f32.xlu1 %v667_v35 }
 0x1e5   : > { %665 = vadd.xlane.f32.xlu0 %v664_v37 }
 0x1e8   : > { %662 = vadd.xlane.f32.xlu1 %v661_v39 }
 0x1e9   : > { %659 = vadd.xlane.f32.xlu0 %v658_v41 }
 0x1ec   : > { %702 = vadd.xlane.f32.xlu1 %v701_v43 }
 0x1ed   : > { %699 = vadd.xlane.f32.xlu0 %v698_v45 }
 0x1f0   : > { %708 = vadd.xlane.f32.xlu1 %v707_v47 }
 0x1f1   : > { %705 = vadd.xlane.f32.xlu0 %v704_v48 }
 0x261   : > { %v654_v49 = vpop.xlane.xlu1 %653 }
 0x262   : > { %v648_v50 = vpop.xlane.xlu0 %647  ;;  %v672_v51 = vmul.f32 0.03125, %v654_v49 }
 0x263   : > { %v1235_v62 = vmul.f32 0.03125, %v648_v50 }
 0x264   : > { %v720_v55 = vmul.f32 %v672_v51, %v672_v51  ;;  %v744_v27 = vsub.f32 %v1176_v9, %v672_v51  ;;  %v1261_v9 = vld [vmem:[%s1332_s6] ss:$0 sm:$0xff] }
 0x265   : > { %v657_v52 = vpop.xlane.xlu1 %656  ;;  %v718_v8 = vmul.f32 %v1235_v62, %v1235_v62 }
 0x266   : > { %v673_v53 = vmul.f32 0.03125, %v657_v52  ;;  %v694_v54 = vpop.xlane.xlu0 %693 }
 0x267   : > { %v712_v56 = vmul.f32 0.03125, %v694_v54 }
 0x268   : > { %v721_v59 = vmul.f32 %v673_v53, %v673_v53  ;;  %v745_v40 = vsub.f32 %v1184_v15, %v673_v53 }
 0x269   : > { %v728_v57 = vsub.f32 %v712_v56, %v720_v55  ;;  %v697_v58 = vpop.xlane.xlu1 %696 }
 0x26a   : > { %v713_v60 = vmul.f32 0.03125, %v697_v58  ;;  %v651_v61 = vpop.xlane.xlu0 %650 }
 0x26b   : > { %v736_v63 = vmax.f32 %v728_v57, 0.0  ;;  %v1237_v0 = vmul.f32 0.03125, %v651_v61 }
 0x26c   : > { %v729_v1 = vsub.f32 %v713_v60, %v721_v59 }
 0x26d   : > { %v752_v2 = vadd.f32 1e-05, %v736_v63  ;;  %v719_v3 = vmul.f32 %v1237_v0, %v1237_v0  ;;  %v691_v4 = vpop.xlane.xlu1 %690  ;;  %v743_v47 = vsub.f32 %v1195_v21, %v1237_v0  ;;  %v742_v21 = vsub.f32 %v1179_v12, %v1235_v62 }
 0x26e   : > { %v737_v5 = vmax.f32 %v729_v1, 0.0  ;;  %v711_v6 = vmul.f32 0.03125, %v691_v4  ;;  %v688_v7 = vpop.xlane.xlu0 %687 }
 0x26f   : > { %1024 = vrsqrt.f32 %v752_v2  ;;  %v710_v10 = vmul.f32 0.03125, %v688_v7 }
 0x270   : > { %v753_v11 = vadd.f32 1e-05, %v737_v5  ;;  %v727_v13 = vsub.f32 %v711_v6, %v719_v3 }
 0x271   : > { %v726_v14 = vsub.f32 %v710_v10, %v718_v8  ;;  %v669_v16 = vpop.xlane.xlu1 %668 }
 0x272   : > { %1026 = vrsqrt.f32 %v753_v11  ;;  %v735_v17 = vmax.f32 %v727_v13, 0.0  ;;  %v666_v18 = vpop.xlane.xlu0 %665  ;;  %v1253_v34 = vmul.f32 0.03125, %v669_v16 }
 0x273   : > { %v734_v19 = vmax.f32 %v726_v14, 0.0  ;;  %v676_v41 = vmul.f32 0.03125, %v666_v18 }
 0x274   : > { %v751_v20 = vadd.f32 1e-05, %v735_v17  ;;  %v725_v51 = vmul.f32 %v1253_v34, %v1253_v34 }
 0x275   : > { %v750_v22 = vadd.f32 1e-05, %v734_v19  ;;  %v663_v23 = vpop.xlane.xlu1 %662  ;;  %v724_v56 = vmul.f32 %v676_v41, %v676_v41 }
 0x276   : > { %1028 = vrsqrt.f32 %v751_v20  ;;  %v1243_v24 = vmul.f32 0.03125, %v663_v23  ;;  %v660_v25 = vpop.xlane.xlu0 %659  ;;  %v749_v20 = vsub.f32 %v1206_v30, %v1253_v34 }
 0x277   : > { %1030 = vrsqrt.f32 %v750_v22  ;;  %v1245_v26 = vmul.f32 0.03125, %v660_v25  ;;  %v748_v25 = vsub.f32 %v1209_v32, %v676_v41 }
 0x278   : > { %v723_v35 = vmul.f32 %v1243_v24, %v1243_v24  ;;  %v747_v13 = vsub.f32 %v1213_v36, %v1243_v24 }
 0x279   : > { %v1025_v28 = vpop.eup %1024  ;;  %v703_v31 = vpop.xlane.xlu1 %702  ;;  %v722_v42 = vmul.f32 %v1245_v26, %v1245_v26  ;;  %v746_v16 = vsub.f32 %v1217_v38, %v1245_v26 }
 0x27a   : > { %v768_v33 = vmul.f32 %v1025_v28, %v744_v27  ;;  %v715_v37 = vmul.f32 0.03125, %v703_v31  ;;  %v700_v39 = vpop.xlane.xlu0 %699 }
 0x27b   : > { %v714_v43 = vmul.f32 0.03125, %v700_v39 }
 0x27c   : > { %v1027_v44 = vpop.eup %1026  ;;  %v783_v45 = vmul.f32 %v1251_v29, %v768_v33  ;;  %v731_v46 = vsub.f32 %v715_v37, %v723_v35 }
 0x27d   : > { %v769_v15 = vmul.f32 %v1027_v44, %v745_v40  ;;  %v730_v48 = vsub.f32 %v714_v43, %v722_v42  ;;  %v709_v49 = vpop.xlane.xlu1 %708 }
 0x27e   : > { %v798_v50 = vadd.f32 %v1261_v9, %v783_v45  ;;  %v739_v52 = vmax.f32 %v731_v46, 0.0  ;;  %v717_v53 = vmul.f32 0.03125, %v709_v49  ;;  %v706_v54 = vpop.xlane.xlu0 %705 }
 0x27f   : > { %v784_v55 = vmul.f32 %v1251_v29, %v769_v15  ;;  %v738_v57 = vmax.f32 %v730_v48, 0.0  ;;  %v716_v58 = vmul.f32 0.03125, %v706_v54 }
 0x280   : > { %v1029_v59 = vpop.eup %1028  ;;  %806 = vst.msk [vmem:[%s1271_s13 + $0x10] sm:$0xff] %vm352_vm0, %v798_v50  ;;  %v755_v60 = vadd.f32 1e-05, %v739_v52  ;;  %v733_v61 = vsub.f32 %v717_v53, %v725_v51 }
 0x281   : > { %v1031_v63 = vpop.eup %1030  ;;  %v799_v0 = vadd.f32 %v1261_v9, %v784_v55  ;;  %v767_v1 = vmul.f32 %v1029_v59, %v743_v47  ;;  %v754_v2 = vadd.f32 1e-05, %v738_v57  ;;  %v732_v3 = vsub.f32 %v716_v58, %v724_v56 }
 0x282   : > { %v766_v4 = vmul.f32 %v1031_v63, %v742_v21  ;;  %1032 = vrsqrt.f32 %v755_v60  ;;  %v741_v5 = vmax.f32 %v733_v61, 0.0 }
 0x283   : > { %807 = vst.msk [vmem:[%s1271_s13 + $0x18] sm:$0xff] %vm352_vm0, %v799_v0  ;;  %v782_v6 = vmul.f32 %v1251_v29, %v767_v1  ;;  %1034 = vrsqrt.f32 %v754_v2  ;;  %v740_v12 = vmax.f32 %v732_v3, 0.0 }
 0x284   : > { %v781_v62 = vmul.f32 %v1251_v29, %v766_v4  ;;  %v757_v7 = vadd.f32 1e-05, %v741_v5 }
 0x285   : > { %v797_v8 = vadd.f32 %v1261_v9, %v782_v6  ;;  %v756_v10 = vadd.f32 1e-05, %v740_v12 }
 0x286   : > { %v796_v11 = vadd.f32 %v1261_v9, %v781_v62  ;;  %1036 = vrsqrt.f32 %v757_v7 }
 0x287   : > { %805 = vst.msk [vmem:[%s1271_s13 + $0x8] sm:$0xff] %vm352_vm0, %v797_v8  ;;  %1038 = vrsqrt.f32 %v756_v10 }
 0x288   : > { %804 = vst.msk [vmem:[%s1271_s13] sm:$0xff] %vm352_vm0, %v796_v11 }
 0x28c   : > { %v1033_v14 = vpop.eup %1032 }
 0x28d   : > { %v1035_v17 = vpop.eup %1034  ;;  %v771_v18 = vmul.f32 %v1033_v14, %v747_v13 }
 0x28e   : > { %v770_v19 = vmul.f32 %v1035_v17, %v746_v16 }
 0x28f   : > { %v786_v22 = vmul.f32 %v1251_v29, %v771_v18 }
 0x290   : > { %v1037_v23 = vpop.eup %1036  ;;  %v785_v36 = vmul.f32 %v1251_v29, %v770_v19 }
 0x291   : > { %v1039_v24 = vpop.eup %1038  ;;  %v801_v27 = vadd.f32 %v1261_v9, %v786_v22  ;;  %v773_v38 = vmul.f32 %v1037_v23, %v749_v20 }
 0x292   : > { %v800_v26 = vadd.f32 %v1261_v9, %v785_v36  ;;  %v772_v28 = vmul.f32 %v1039_v24, %v748_v25 }
 0x293   : > { %809 = vst.msk [vmem:[%s1271_s13 + $0x28] sm:$0xff] %vm352_vm0, %v801_v27  ;;  %v788_v30 = vmul.f32 %v1251_v29, %v773_v38 }
 0x294   : > { %808 = vst.msk [vmem:[%s1271_s13 + $0x20] sm:$0xff] %vm352_vm0, %v800_v26  ;;  %v787_v31 = vmul.f32 %v1251_v29, %v772_v28 }
 0x295   : > { %v803_v33 = vadd.f32 %v1261_v9, %v788_v30 }
 0x296   : > { %v802_v32 = vadd.f32 %v1261_v9, %v787_v31 }
 0x297   : > { %811 = vst.msk [vmem:[%s1271_s13 + $0x38] sm:$0xff] %vm352_vm0, %v803_v33 }
 0x298   : > { %810 = vst.msk [vmem:[%s1271_s13 + $0x30] sm:$0xff] %vm352_vm0, %v802_v32 }
 0x299 PF: > { %s17_s26 = sadd.s32 1, %s1062_s26   ;;  %s1334_s24 = smov %s1058_s25 }
 0x29a   : > { %p14_p5 = scmp.ge.s32.totalorder %s17_s26, 4   ;;  %s1335_s25 = smov %s1337_s27 }
 0x29c   :  { %16 = sbr.rel (!%p14_p5) target bundleno = 2 (0x2), region = 95 }

</bundles_post_ra>
